<compile_context>
chip_gen: v7x
topology: tpu7x:2x2x1
jax: 0.10.0
libtpu: 0.0.40
codegen_flags: <defaults>
</compile_context>

<pallas_src>
import functools

import jax
import jax.numpy as jnp
from jax.experimental import pallas as pl
from jax.experimental.pallas import tpu as pltpu


def _round_up(v, m):
    return ((v + m - 1) // m) * m


def _dice_partial_kernel(x_ref, t_ref, inter_ref, den_ref, inter_acc, den_acc, *,
                         logits, d_valid, tile_d, chunk_d, tiles_per_split,
                         total_tiles, needs_mask):
    j = pl.program_id(1)
    rows = x_ref.shape[0]

    @pl.when(j == 0)
    def _():
        inter_acc[...] = jnp.zeros_like(inter_acc)
        den_acc[...] = jnp.zeros_like(den_acc)

    g = pl.program_id(0) * tiles_per_split + j        # global D-tile index

    def fold128(v):
        # Pairwise tree-fold of a (rows, m*128) value to (rows, 128): pure VALU
        # adds on 128-aligned static slices (no cross-lane XLU work per tile).
        m = v.shape[1] // 128
        parts = [v[:, i * 128:(i + 1) * 128] for i in range(m)]
        while len(parts) > 1:
            nxt = [parts[i] + parts[i + 1] for i in range(0, len(parts) - 1, 2)]
            if len(parts) % 2:
                nxt.append(parts[-1])
            parts = nxt
        return parts[0]

    def process(masked):
        inter_v = inter_acc[...]
        den_v = den_acc[...]
        # Chunk the tile so f32 temporaries stay small; the pipelined input
        # blocks (not temporaries) dominate VMEM.
        for c0 in range(0, tile_d, chunk_d):
            w = min(chunk_d, tile_d - c0)
            x = x_ref[:, c0:c0 + w].astype(jnp.float32)
            t = t_ref[:, c0:c0 + w].astype(jnp.float32)
            if logits:
                # sigmoid(x) == 0.5*tanh(0.5*x) + 0.5 : single EUP op.
                x = 0.5 * jnp.tanh(0.5 * x) + 0.5
            if masked:
                cols = (g * tile_d + c0) + jax.lax.broadcasted_iota(
                    jnp.int32, x.shape, 1)
                keep = cols < d_valid
                x = jnp.where(keep, x, 0.0)
                t = jnp.where(keep, t, 0.0)
            prod = x * t
            den = x + t
            if w % 128 == 0:
                inter_v = inter_v + fold128(prod)
                den_v = den_v + fold128(den)
            else:
                # Only for a small full-D block whose width isn't 128-aligned:
                # reduce to one column and deposit it in lane 0.
                lane0 = jax.lax.broadcasted_iota(jnp.int32, (rows, 128), 1) == 0
                inter_v = inter_v + jnp.where(
                    lane0, jnp.sum(prod, axis=1, keepdims=True), 0.0)
                den_v = den_v + jnp.where(
                    lane0, jnp.sum(den, axis=1, keepdims=True), 0.0)
        inter_acc[...] = inter_v
        den_acc[...] = den_v

    if needs_mask:
        # Only the globally-last tile can overhang d_valid: gate the masking
        # so every other grid step runs the mask-free path.
        is_last = g == (total_tiles - 1)

        @pl.when(jnp.logical_not(is_last))
        def _():
            process(masked=False)

        @pl.when(is_last)
        def _():
            process(masked=True)
    else:
        process(masked=False)

    @pl.when(j == pl.num_programs(1) - 1)
    def _():
        # Lane-dense (rows, 128) stores; cross-lane reduce happens in the
        # JAX epilogue.
        inter_ref[0] = inter_acc[...]
        den_ref[0] = den_acc[...]


def _choose_tile_d(rows, d_view, x_dtype, t_dtype, max_tile_d, input_budget):
    """Largest 128-aligned D-tile whose double-buffered input blocks fit the
    budget, preferring (a) exact divisors of D (no masking emitted) and
    (b) an even tile count (so the 2-way v7x core split engages)."""
    def bytes_per_col(dtype):
        item = jnp.dtype(dtype).itemsize
        sub = max(8, 32 // max(item, 1))       # sublane pad: f32 8, bf16 16, i8 32
        return _round_up(rows, sub) * item

    per_col = (bytes_per_col(x_dtype) + bytes_per_col(t_dtype)) * 2  # 2 pipeline bufs
    tile = input_budget // max(per_col, 1)
    tile = min(tile, 65536)                    # bound per-step unroll / compile time
    if max_tile_d is not None:
        tile = min(tile, max_tile_d)
    if tile >= d_view:
        return d_view                          # single block covering all of D
    tile = max(128, (tile // 128) * 128)

    # (a) prefer a tile that divides D exactly -> masking never emitted.
    if d_view % 128 == 0:
        lo = max(128, ((tile * 3 // 4) // 128) * 128)
        best = None
        for cand in range(tile, lo - 1, -128):
            if d_view % cand == 0:
                if (d_view // cand) % 2 == 0:
                    return cand                # divisor AND even tile count
                if best is None:
                    best = cand
        if best is not None:
            return best

    # (b) nudge one 128-step down if that makes the tile count even (v7x split).
    if (tile > 128 and pl.cdiv(d_view, tile) % 2 == 1
            and pl.cdiv(d_view, tile - 128) % 2 == 0):
        return tile - 128
    return tile


def _choose_chunk_d(rows, tile_d, max_chunk_d):
    """In-kernel chunk width: keeps per-chunk f32 temporaries ~<= 256 KiB."""
    rows_pad = _round_up(rows, 8)
    target = (256 * 1024) // max(rows_pad * 4, 1)
    chunk = min(target, tile_d)
    chunk = max(128, (chunk // 128) * 128)
    if max_chunk_d is not None:
        chunk = max(128, min(chunk, (max_chunk_d // 128) * 128))
    return chunk


def dice_loss(x, target, logits=True, *, max_tile_d=None, max_chunk_d=None):
    """Pallas implementation of DiceLoss.forward(input, target, logits)."""
    n = x.shape[0]
    x2 = x.reshape(n, -1)
    t2 = target.reshape(n, -1)
    d = x2.shape[1]

    if t2.dtype == jnp.bool_:
        t2 = t2.astype(jnp.int8)

    # Sublane-pack small batches: view (n, d) as (n*R, d//R); row-major reshape,
    # no data movement; per-sample sums are recovered in the epilogue.
    R = 1
    if n < 8:
        for r in (8, 4, 2):
            if d % r == 0:
                R = r
                break
    rows = n * R
    d_view = d // R
    x2 = x2.reshape(rows, d_view)
    t2 = t2.reshape(rows, d_view)

    # Per-generation VMEM sizing: physical VMEM if queryable, else assume the
    # smallest modern case (v7x: 64 MiB per TensorCore).
    try:
        phys_vmem = int(pltpu.get_tpu_info().vmem_capacity_bytes)
    except Exception:  # pragma: no cover - conservative fallback
        phys_vmem = 64 << 20
    input_budget = min(phys_vmem // 4, 24 << 20)        # pipelined input blocks
    vmem_limit = int(min(input_budget + (16 << 20), (phys_vmem * 3) // 4))

    tile_d = _choose_tile_d(rows, d_view, x2.dtype, t2.dtype, max_tile_d,
                            input_budget)
    chunk_d = _choose_chunk_d(rows, tile_d, max_chunk_d)
    total_tiles = pl.cdiv(d_view, tile_d)
    # 2-way reduction split: uses both TensorCores on v7x; sequential (and
    # essentially free) on single-TC chips.
    num_splits = 2 if (total_tiles >= 2 and total_tiles % 2 == 0) else 1
    tiles_per_split = total_tiles // num_splits
    needs_mask = (d_view % tile_d) != 0

    kernel = functools.partial(
        _dice_partial_kernel, logits=logits, d_valid=d_view, tile_d=tile_d,
        chunk_d=chunk_d, tiles_per_split=tiles_per_split,
        total_tiles=total_tiles, needs_mask=needs_mask)

    part_shape = jax.ShapeDtypeStruct((num_splits, rows, 128), jnp.float32)
    out_spec = pl.BlockSpec((1, rows, 128), lambda s, j: (s, 0, 0))
    in_spec = pl.BlockSpec((rows, tile_d),
                           lambda s, j: (0, s * tiles_per_split + j))

    inter_p, den_p = pl.pallas_call(
        kernel,
        out_shape=(part_shape, part_shape),
        grid_spec=pltpu.PrefetchScalarGridSpec(
            num_scalar_prefetch=0,
            grid=(num_splits, tiles_per_split),
            in_specs=[in_spec, in_spec],
            out_specs=(out_spec, out_spec),
            scratch_shapes=[
                pltpu.VMEM((rows, 128), jnp.float32),
                pltpu.VMEM((rows, 128), jnp.float32),
            ],
        ),
        compiler_params=pltpu.CompilerParams(
            dimension_semantics=("parallel", "arbitrary"),
            vmem_limit_bytes=vmem_limit,
        ),
    )(x2, t2)

    # Tiny plain-JAX epilogue: cross-lane + cross-split reduce, un-pack R, loss.
    inter = jnp.sum(inter_p, axis=(0, 2))
    den = jnp.sum(den_p, axis=(0, 2))
    if R > 1:
        inter = inter.reshape(n, R).sum(axis=1)
        den = den.reshape(n, R).sum(axis=1)
    smooth = jnp.float32(1.0)
    per_sample = 2.0 * (inter + smooth) / (den + smooth)
    return jnp.float32(1.0) - jnp.sum(per_sample) / jnp.float32(n)


def dice_loss_ref(x, target, logits=True):
    """Pure-JAX reference mirroring the PyTorch module."""
    n = x.shape[0]
    xf = x.reshape(n, -1).astype(jnp.float32)
    tf = target.reshape(n, -1).astype(jnp.float32)
    if logits:
        xf = jax.nn.sigmoid(xf)
    smooth = 1.0
    inter = jnp.sum(xf * tf, axis=1)
    loss = 2.0 * (inter + smooth) / (jnp.sum(xf, axis=1) + jnp.sum(tf, axis=1) + smooth)
    return 1.0 - jnp.sum(loss) / n


if __name__ == "__main__":
    key = jax.random.PRNGKey(0)
    k1, k2, k3, k4, k5, k6 = jax.random.split(key, 6)

    # 1) Primary: small NCHW segmentation-style inputs (logits + binary mask).
    x = jax.random.normal(k1, (2, 4, 16, 16), dtype=jnp.float32)
    target = (jax.random.uniform(k2, (2, 4, 16, 16)) > 0.5).astype(jnp.float32)
    out = dice_loss(x, target, logits=True)
    jax.block_until_ready(out)
    ref = dice_loss_ref(x, target, logits=True)
    assert jnp.allclose(out, ref, atol=2e-5, rtol=2e-5), (out, ref)

    # 2) logits=False path (inputs already probabilities).
    probs = jax.nn.sigmoid(x)
    out2 = dice_loss(probs, target, logits=False)
    jax.block_until_ready(out2)
    ref2 = dice_loss_ref(probs, target, logits=False)
    assert jnp.allclose(out2, ref2, atol=2e-5, rtol=2e-5), (out2, ref2)

    # 3) Multi-tile grid, 2-way split, bf16 inputs and the pl.when-gated masked
    #    last tile (tile forced small on purpose).
    x3 = jax.random.normal(k3, (2, 14, 16, 16), dtype=jnp.bfloat16)
    t3 = (jax.random.uniform(k4, (2, 14, 16, 16)) > 0.5).astype(jnp.bfloat16)
    out3 = dice_loss(x3, t3, logits=True, max_tile_d=128)
    jax.block_until_ready(out3)
    ref3 = dice_loss_ref(x3, t3, logits=True)
    assert jnp.allclose(out3, ref3, atol=1e-4, rtol=1e-4), (out3, ref3)

    # 4) D not a multiple of 128 (full-dim block + lane-0 tail reduction path).
    x4 = jax.random.normal(k5, (3, 5, 7, 9), dtype=jnp.float32)
    t4 = (jax.random.uniform(k6, (3, 5, 7, 9)) > 0.5).astype(jnp.float32)
    out4 = dice_loss(x4, t4, logits=True)
    jax.block_until_ready(out4)
    ref4 = dice_loss_ref(x4, t4, logits=True)
    assert jnp.allclose(out4, ref4, atol=2e-5, rtol=2e-5), (out4, ref4)

    # 5) Multi-chunk in-kernel loop (chunk forced small on purpose).
    x5 = jax.random.normal(k1, (2, 8, 32, 32), dtype=jnp.float32)
    t5 = (jax.random.uniform(k2, (2, 8, 32, 32)) > 0.5).astype(jnp.float32)
    out5 = dice_loss(x5, t5, logits=True, max_chunk_d=256)
    jax.block_until_ready(out5)
    ref5 = dice_loss_ref(x5, t5, logits=True)
    assert jnp.allclose(out5, ref5, atol=2e-5, rtol=2e-5), (out5, ref5)

    print("KERNEL_OK")
</pallas_src>

<mosaic_0001>
module attributes {stable_mosaic.version = 11 : i64} {
  func.func @_dice_partial_kernel(%arg0: i32, %arg1: i32, %arg2: memref<16x128xf32, #tpu.memory_space<vmem>>, %arg3: memref<16x128xf32, #tpu.memory_space<vmem>>, %arg4: memref<1x16x128xf32, #tpu.memory_space<vmem>>, %arg5: memref<1x16x128xf32, #tpu.memory_space<vmem>>, %arg6: memref<16x128xf32, #tpu.memory_space<vmem>>, %arg7: memref<16x128xf32, #tpu.memory_space<vmem>>) attributes {dimension_semantics = [#tpu.dimension_semantics<parallel>, #tpu.dimension_semantics<arbitrary>], iteration_bounds = array<i64: 1, 1>, scalar_prefetch = 0 : i64, scratch_operands = 2 : i64, tpu.core_type = #tpu.core_type<tc>, window_params = [{transform_indices = @transform_0, window_bounds = array<i64: 16, 128>}, {transform_indices = @transform_1, window_bounds = array<i64: 16, 128>}, {transform_indices = @transform_2, window_bounds = array<i64: 1, 16, 128>}, {transform_indices = @transform_3, window_bounds = array<i64: 1, 16, 128>}]} {
    %c0_i32 = arith.constant 0 : i32
    %0 = arith.cmpi eq, %arg1, %c0_i32 : i32
    %1 = arith.extui %0 : i1 to i32
    %c0_i32_0 = arith.constant 0 : i32
    %2 = arith.cmpi ne, %1, %c0_i32_0 : i32
    scf.if %2 {
      %cst_16 = arith.constant 0.000000e+00 : f32
      %23 = vector.broadcast %cst_16 : f32 to vector<16x128xf32>
      %c0_17 = arith.constant 0 : index
      %c0_18 = arith.constant 0 : index
      %24 = vector.load %arg6[%c0_17, %c0_18] : memref<16x128xf32, #tpu.memory_space<vmem>>, vector<16x128xf32>
      tpu.vector_store %arg6[%c0_17, %c0_18], %23 {strides = array<i32>} : memref<16x128xf32, #tpu.memory_space<vmem>>, vector<16x128xf32>,
      %cst_19 = arith.constant 0.000000e+00 : f32
      %25 = vector.broadcast %cst_19 : f32 to vector<16x128xf32>
      %c0_20 = arith.constant 0 : index
      %c0_21 = arith.constant 0 : index
      %26 = vector.load %arg7[%c0_20, %c0_21] : memref<16x128xf32, #tpu.memory_space<vmem>>, vector<16x128xf32>
      tpu.vector_store %arg7[%c0_20, %c0_21], %25 {strides = array<i32>} : memref<16x128xf32, #tpu.memory_space<vmem>>, vector<16x128xf32>,
    } else {
    }
    %c0 = arith.constant 0 : index
    %c0_1 = arith.constant 0 : index
    %3 = vector.load %arg6[%c0, %c0_1] : memref<16x128xf32, #tpu.memory_space<vmem>>, vector<16x128xf32>
    %c0_2 = arith.constant 0 : index
    %c0_3 = arith.constant 0 : index
    %4 = vector.load %arg7[%c0_2, %c0_3] : memref<16x128xf32, #tpu.memory_space<vmem>>, vector<16x128xf32>
    %c0_4 = arith.constant 0 : index
    %c0_5 = arith.constant 0 : index
    %5 = vector.load %arg2[%c0_4, %c0_5] : memref<16x128xf32, #tpu.memory_space<vmem>>, vector<16x128xf32>
    %c0_6 = arith.constant 0 : index
    %c0_7 = arith.constant 0 : index
    %6 = vector.load %arg3[%c0_6, %c0_7] : memref<16x128xf32, #tpu.memory_space<vmem>>, vector<16x128xf32>
    %cst = arith.constant 5.000000e-01 : f32
    %7 = vector.broadcast %cst : f32 to vector<16x128xf32>
    %8 = arith.mulf %7, %5 : vector<16x128xf32>
    %9 = math.tanh %8 : vector<16x128xf32>
    %cst_8 = arith.constant 5.000000e-01 : f32
    %10 = vector.broadcast %cst_8 : f32 to vector<16x128xf32>
    %11 = arith.mulf %10, %9 : vector<16x128xf32>
    %cst_9 = arith.constant 5.000000e-01 : f32
    %12 = vector.broadcast %cst_9 : f32 to vector<16x128xf32>
    %13 = arith.addf %11, %12 : vector<16x128xf32>
    %14 = arith.mulf %13, %6 : vector<16x128xf32>
    %15 = arith.addf %13, %6 : vector<16x128xf32>
    %16 = arith.addf %3, %14 : vector<16x128xf32>
    %17 = arith.addf %4, %15 : vector<16x128xf32>
    %c0_10 = arith.constant 0 : index
    %c0_11 = arith.constant 0 : index
    %18 = vector.load %arg6[%c0_10, %c0_11] : memref<16x128xf32, #tpu.memory_space<vmem>>, vector<16x128xf32>
    tpu.vector_store %arg6[%c0_10, %c0_11], %16 {strides = array<i32>} : memref<16x128xf32, #tpu.memory_space<vmem>>, vector<16x128xf32>,
    %c0_12 = arith.constant 0 : index
    %c0_13 = arith.constant 0 : index
    %19 = vector.load %arg7[%c0_12, %c0_13] : memref<16x128xf32, #tpu.memory_space<vmem>>, vector<16x128xf32>
    tpu.vector_store %arg7[%c0_12, %c0_13], %17 {strides = array<i32>} : memref<16x128xf32, #tpu.memory_space<vmem>>, vector<16x128xf32>,
    %c0_i32_14 = arith.constant 0 : i32
    %20 = arith.cmpi eq, %arg1, %c0_i32_14 : i32
    %21 = arith.extui %20 : i1 to i32
    %c0_i32_15 = arith.constant 0 : i32
    %22 = arith.cmpi ne, %21, %c0_i32_15 : i32
    scf.if %22 {
      %c0_16 = arith.constant 0 : index
      %c0_17 = arith.constant 0 : index
      %23 = vector.load %arg6[%c0_16, %c0_17] : memref<16x128xf32, #tpu.memory_space<vmem>>, vector<16x128xf32>
      %c0_18 = arith.constant 0 : index
      %c0_19 = arith.constant 0 : index
      %c0_20 = arith.constant 0 : index
      %24 = vector.load %arg4[%c0_18, %c0_19, %c0_20] : memref<1x16x128xf32, #tpu.memory_space<vmem>>, vector<1x16x128xf32>
      %25 = vector.shape_cast %24 : vector<1x16x128xf32> to vector<16x128xf32>
      %26 = vector.shape_cast %23 : vector<16x128xf32> to vector<1x16x128xf32>
      tpu.vector_store %arg4[%c0_18, %c0_19, %c0_20], %26 {strides = array<i32>} : memref<1x16x128xf32, #tpu.memory_space<vmem>>, vector<1x16x128xf32>,
      %c0_21 = arith.constant 0 : index
      %c0_22 = arith.constant 0 : index
      %27 = vector.load %arg7[%c0_21, %c0_22] : memref<16x128xf32, #tpu.memory_space<vmem>>, vector<16x128xf32>
      %c0_23 = arith.constant 0 : index
      %c0_24 = arith.constant 0 : index
      %c0_25 = arith.constant 0 : index
      %28 = vector.load %arg5[%c0_23, %c0_24, %c0_25] : memref<1x16x128xf32, #tpu.memory_space<vmem>>, vector<1x16x128xf32>
      %29 = vector.shape_cast %28 : vector<1x16x128xf32> to vector<16x128xf32>
      %30 = vector.shape_cast %27 : vector<16x128xf32> to vector<1x16x128xf32>
      tpu.vector_store %arg5[%c0_23, %c0_24, %c0_25], %30 {strides = array<i32>} : memref<1x16x128xf32, #tpu.memory_space<vmem>>, vector<1x16x128xf32>,
    } else {
    }
    return
  }
  func.func @transform_0(%arg0: i32, %arg1: i32) -> (i32, i32) {
    %c1_i32 = arith.constant 1 : i32
    %0 = arith.muli %arg0, %c1_i32 : i32
    %1 = arith.addi %0, %arg1 : i32
    %c0_i32 = arith.constant 0 : i32
    %c0_i32_0 = arith.constant 0 : i32
    return %c0_i32, %1 : i32, i32
  }
  func.func @transform_1(%arg0: i32, %arg1: i32) -> (i32, i32) {
    %c1_i32 = arith.constant 1 : i32
    %0 = arith.muli %arg0, %c1_i32 : i32
    %1 = arith.addi %0, %arg1 : i32
    %c0_i32 = arith.constant 0 : i32
    %c0_i32_0 = arith.constant 0 : i32
    return %c0_i32, %1 : i32, i32
  }
  func.func @transform_2(%arg0: i32, %arg1: i32) -> (i32, i32, i32) {
    %c0_i32 = arith.constant 0 : i32
    %c0_i32_0 = arith.constant 0 : i32
    %c0_i32_1 = arith.constant 0 : i32
    return %arg0, %c0_i32, %c0_i32_0 : i32, i32, i32
  }
  func.func @transform_3(%arg0: i32, %arg1: i32) -> (i32, i32, i32) {
    %c0_i32 = arith.constant 0 : i32
    %c0_i32_0 = arith.constant 0 : i32
    %c0_i32_1 = arith.constant 0 : i32
    return %arg0, %c0_i32, %c0_i32_0 : i32, i32, i32
  }
}

</mosaic_0001>

<bundles_post_ra>
// kernel: tpu_custom_call.1
= control target key start
LH: loop header
LB: loop body
LE: loop exit
PB: predicated region body
PF: predicated region fallthrough
CT: control target
= control target key end

     0   :  { %9 = vsyncpa [#allocation5], 0  ;;  %s331_s0 = inlined_call_operand.hbm [shape: f32[16,128], index: 0, kind: input, shape index: {}]   ;;  %s332_s1 = inlined_call_operand.hbm [shape: f32[16,128], index: 1, kind: input, shape index: {}]   ;;  %s333_s2 = inlined_call_operand.hbm [shape: f32[1,16,128], index: 2, kind: output, shape index: {0}]   ;;  %s334_s3 = inlined_call_operand.hbm [shape: f32[1,16,128], index: 3, kind: output, shape index: {1}]  }
   0x1   :  { %10 = vsyncpa [#allocation8], 0 }
   0x2   :  { %11 = vsyncpa [#allocation6], 0 }
   0x3   :  { %12 = vsyncpa [#allocation11], 0  ;;  %s238_s12 = smov [#allocation4]   ;;  %s142_s16 = scalar_lea.hbm %s331_s0, 256 }
   0x4   :  { %s21_s13 = sshll.u32 %s238_s12, 4  ;;  %p143_p0 = scmp.ne.s32.totalorder %s331_s0, %s142_s16  ;;  %s22_s13 = int_to_ptr.vmem [resolvable:$true] %s21_s13 }
   0x5   :  { %p146_p1 = scmp.lt.u32.totalorder %s142_s16, %s331_s0 }
   0x7   :  { %p148_p2 = pnand %p146_p1, %p143_p0 }
   0x9   :  { %151 = shalt.err (!%p148_p2)
}
   0xa   :  { %s152_s21 = scalar_lea.vmem %s22_s13, 256  ;;  %p157_p4 = scmp.lt.s32.totalorder %s22_s13, %s22_s13 }
   0xb   :  { %p153_p3 = scmp.ne.s32.totalorder %s22_s13, %s152_s21  ;;  %p158_p5 = scmp.lt.s32.totalorder %s152_s21, %s152_s21 }
   0xd   :  { %p159_p6 = por %p158_p5, %p157_p4 }
   0xf   :  { %p160_p7 = pnand %p159_p6, %p153_p3 }
  0x11   :  { %163 = shalt.err (!%p160_p7)
}
  0x12   :  { %s239_s22 = smov 128   ;;  %s240_s23 = smov 8  }
  0x13   :  { %27 = dma.hbm_to_vmem [thread:$0]  %s331_s0, 256, %s22_s13, [#allocation5], %s239_s22, %s239_s22, %s240_s23  }
  0x14   :  { %s241_s26 = smov [#allocation7]   ;;  %s164_s30 = scalar_lea.hbm %s332_s1, 256 }
  0x15   :  { %s36_s27 = sshll.u32 %s241_s26, 4  ;;  %p165_p8 = scmp.ne.s32.totalorder %s332_s1, %s164_s30  ;;  %s37_s27 = int_to_ptr.vmem [resolvable:$true] %s36_s27 }
  0x16   :  { %p168_p9 = scmp.lt.u32.totalorder %s164_s30, %s332_s1 }
  0x18   :  { %p170_p10 = pnand %p168_p9, %p165_p8 }
  0x1a   :  { %173 = shalt.err (!%p170_p10)
}
  0x1b   :  { %s174_s8 = scalar_lea.vmem %s37_s27, 256  ;;  %p179_p12 = scmp.lt.s32.totalorder %s37_s27, %s37_s27 }
  0x1c   :  { %p175_p11 = scmp.ne.s32.totalorder %s37_s27, %s174_s8  ;;  %p180_p13 = scmp.lt.s32.totalorder %s174_s8, %s174_s8 }
  0x1e   :  { %p181_p0 = por %p180_p13, %p179_p12 }
  0x20   :  { %p182_p1 = pnand %p181_p0, %p175_p11 }
  0x22   :  { %185 = shalt.err (!%p182_p1)
}
  0x23   :  { %42 = dma.hbm_to_vmem [thread:$0]  %s332_s1, 256, %s37_s27, [#allocation8], %s239_s22, %s239_s22, %s240_s23  }
  0x24   :  { %230 = dma.done.wait [#allocation5], 256  }
  0x25   :  { %231 = vsyncadd [#allocation5], 4294967040 }
  0x26   :  { %232 = dma.done.wait [#allocation8], 256  }
  0x27   :  { %233 = vsyncadd [#allocation8], 4294967040  ;;  %v63_v0 = vld [vmem:[#allocation4] sm:$0xff]  ;;  %v64_v1 = vld [vmem:[#allocation4 + $0x8] sm:$0xff]  ;;  %s242_s10 = smov [#allocation9]   ;;  %s243_s1 = smov [#allocation10]  }
  0x28   :  { %v67_v2 = vmul.f32 0.5, %v63_v0  ;;  %v68_v3 = vmul.f32 0.5, %v64_v1  ;;  %v65_v7 = vld [vmem:[#allocation7] sm:$0xff]  ;;  %v66_v10 = vld [vmem:[#allocation7 + $0x8] sm:$0xff]  ;;  %s103_s11 = sshll.u32 %s242_s10, 4  ;;  %s115_s12 = sshll.u32 %s243_s1, 4  ;;  %s104_s11 = int_to_ptr.vmem [resolvable:$true] %s103_s11  ;;  %s294_s12 = int_to_ptr.vmem [resolvable:$true] %s115_s12 }
  0x29   :  { %s186_s13 = scalar_lea.vmem %s104_s11, 256  ;;  %p191_p3 = scmp.lt.s32.totalorder %s104_s11, %s104_s11 }
  0x2a   :  { %138 = vtanh.f32 %v67_v2  ;;  %p187_p2 = scmp.ne.s32.totalorder %s104_s11, %s186_s13  ;;  %p192_p4 = scmp.lt.s32.totalorder %s186_s13, %s186_s13 }
  0x2b   :  { %140 = vtanh.f32 %v68_v3 }
  0x2c   :  { %p193_p5 = por %p192_p4, %p191_p3 }
  0x2e   :  { %p194_p6 = pnand %p193_p5, %p187_p2 }
  0x34   :  { %v139_v4 = vpop.eup %138 }
  0x35   :  { %v141_v5 = vpop.eup %140  ;;  %v71_v6 = vmul.f32 0.5, %v139_v4 }
  0x36   :  { %v72_v8 = vmul.f32 0.5, %v141_v5 }
  0x37   :  { %v73_v9 = vadd.f32 0.5, %v71_v6 }
  0x38   :  { %v74_v11 = vadd.f32 0.5, %v72_v8 }
  0x39   :  { %v75_v12 = vmul.f32 %v73_v9, %v65_v7  ;;  %v77_v13 = vadd.f32 %v73_v9, %v65_v7 }
  0x3a   :  { %v76_v14 = vmul.f32 %v74_v11, %v66_v10  ;;  %v78_v15 = vadd.f32 %v74_v11, %v66_v10 }
  0x3b   :  { %92 = vst [vmem:[#allocation9] sm:$0xff] %v75_v12  ;;  %96 = vst [vmem:[#allocation10] sm:$0xff] %v77_v13 }
  0x3c   :  { %93 = vst [vmem:[#allocation9 + $0x8] sm:$0xff] %v76_v14  ;;  %97 = vst [vmem:[#allocation10 + $0x8] sm:$0xff] %v78_v15 }
  0x3d   :  { %197 = shalt.err (!%p194_p6)
}
  0x3e   :  { %s198_s16 = scalar_lea.hbm %s333_s2, 256 }
  0x3f   :  { %p199_p7 = scmp.ne.s32.totalorder %s333_s2, %s198_s16  ;;  %p202_p8 = scmp.lt.u32.totalorder %s198_s16, %s333_s2 }
  0x41   :  { %p204_p9 = pnand %p202_p8, %p199_p7 }
  0x43   :  { %207 = shalt.err (!%p204_p9)
}
  0x44   :  { %109 = dma.vmem_to_hbm [thread:$0]  %s104_s11, 256, %s333_s2, [#allocation6], %s239_s22, %s239_s22, %s240_s23  }
  0x45   :  { %s208_s25 = scalar_lea.vmem %s294_s12, 256  ;;  %p213_p11 = scmp.lt.s32.totalorder %s294_s12, %s294_s12 }
  0x46   :  { %p209_p10 = scmp.ne.s32.totalorder %s294_s12, %s208_s25  ;;  %p214_p12 = scmp.lt.s32.totalorder %s208_s25, %s208_s25 }
  0x48   :  { %p215_p13 = por %p214_p12, %p213_p11 }
  0x4a   :  { %p216_p0 = pnand %p215_p13, %p209_p10 }
  0x4c   :  { %219 = shalt.err (!%p216_p0)
}
  0x4d   :  { %s220_s28 = scalar_lea.hbm %s334_s3, 256 }
  0x4e   :  { %p221_p1 = scmp.ne.s32.totalorder %s334_s3, %s220_s28  ;;  %p224_p2 = scmp.lt.u32.totalorder %s220_s28, %s334_s3 }
  0x50   :  { %p226_p3 = pnand %p224_p2, %p221_p1 }
  0x52   :  { %229 = shalt.err (!%p226_p3)
}
  0x53   :  { %121 = dma.vmem_to_hbm [thread:$0]  %s294_s12, 256, %s334_s3, [#allocation11], %s239_s22, %s239_s22, %s240_s23  }
  0x54   :  { %234 = dma.done.wait [#allocation6], 256  }
  0x55   :  { %235 = vsyncadd [#allocation6], 4294967040 }
  0x56   :  { %236 = dma.done.wait [#allocation11], 256  }
  0x57   :  { %237 = vsyncadd [#allocation11], 4294967040 }
  0x58   :  { %128 = vsyncpa [#allocation5], 1 }
  0x59   :  { %129 = vsyncpa [#allocation8], 1 }
  0x5a   :  { %130 = vsyncpa [#allocation6], 1 }
  0x5b   :  { %131 = vsyncpa [#allocation11], 1 }

</bundles_post_ra>
